<compile_context>
chip_gen: v7x
topology: tpu7x:2x2x1
jax: 0.10.0
libtpu: 0.0.40
codegen_flags: <defaults>
</compile_context>

<pallas_src>
import numpy as np
import jax
import jax.numpy as jnp
from jax import lax
from jax.experimental import pallas as pl
from jax.experimental.pallas import tpu as pltpu


# ---------------- fused Pallas kernel ----------------

def _fused_patch_embed_kernel(lhs_e_ref, lhs_o_ref, w1_ref, s1_ref, t1_ref,
                              w2a_ref, w2b_ref, w2c_ref, s2_ref, t2_ref,
                              mask_ref, o_ref):
    """One batch tile (BT images, M = BT*q rows, q = H/4 output rows per image).

    lhs_e_ref / lhs_o_ref: (M, 3*K1) even / odd parity conv1 LHS (the 3 ky taps
                           of each output row laid out contiguously; stride-2 and
                           H/W zero padding already folded into the layout)
    w1_ref:   (3*K1, N1)  tap-merged structured conv1 weights
    w2a/b/c:  (N1, N2)    structured conv2 weights for ky = 1 / 2 / 0
    s*/t*:    (1, N1) / (1, N2)  folded BN (+post_affine) scale / shift
    mask_ref: (M, 1)      zero on the first output row of every image (the ky=0
                          tap there reads the H-pad zero row)
    o_ref:    (M, N2)     output rows (b, oy2) x (ox2*embed_dim + c)
    """
    f32 = jnp.float32
    inv_sqrt2 = np.float32(0.7071067811865476)

    # ---- conv1: one tap-merged matmul per row parity ----
    w1 = w1_ref[...]
    he = jnp.dot(lhs_e_ref[...], w1, preferred_element_type=f32)   # even rows oy1=2e
    ho = jnp.dot(lhs_o_ref[...], w1, preferred_element_type=f32)   # odd  rows oy1=2o+1

    # fused BN1 + exact GELU (matches nn.GELU default)
    s1 = s1_ref[...]
    t1 = t1_ref[...]
    he = he * s1 + t1
    ho = ho * s1 + t1
    he = 0.5 * he * (1.0 + lax.erf(he * inv_sqrt2))
    ho = 0.5 * ho * (1.0 + lax.erf(ho * inv_sqrt2))

    # ---- conv2: ky=1 tap reads he, ky=2 tap reads ho, ky=0 tap reads ho
    # shifted down one row (XLU roll + host-precomputed mask, not a matmul) ----
    acc = jnp.dot(he, w2a_ref[...], preferred_element_type=f32)
    acc = acc + jnp.dot(ho, w2b_ref[...], preferred_element_type=f32)
    c0 = jnp.dot(ho, w2c_ref[...], preferred_element_type=f32)
    acc = acc + pltpu.roll(c0, shift=1, axis=0) * mask_ref[...]

    # fused BN2 + post_affine
    o_ref[...] = acc * s2_ref[...] + t2_ref[...]


# ---------------- wrapper ----------------

def conv_patch_embed_forward(x_nchw, prep):
    """NCHW input -> (B, num_patches, embed_dim) with one fused Pallas kernel."""
    B, C, H, W = x_nchw.shape
    assert H % 4 == 0 and W % 4 == 0
    q = H // 4                                       # conv2 output rows per image
    K1 = C * W                                       # per-row width (layout ci*W + wx)
    W1cat = prep["W1cat"]
    N1 = W1cat.shape[1]
    N2 = prep["W2a"].shape[1]

    # pre_affine (must happen BEFORE the conv zero padding), lay each padded
    # image row out as (ci, wx), then im2row the 3 overlapping ky taps so conv1
    # becomes a single tap-merged matmul per row parity.  This is the only XLA
    # glue; it fuses into a couple of tiny elementwise/copy ops.
    x = (x_nchw.astype(jnp.float32) * prep["pre_alpha"].reshape(1, -1, 1, 1)
         + prep["pre_beta"].reshape(1, -1, 1, 1))
    xr = jnp.pad(jnp.transpose(x, (0, 2, 1, 3)),           # (B, H, C, W), H-pad
                 ((0, 0), (1, 1), (0, 0), (0, 0))).reshape(B, H + 2, K1)
    # even output row 2e reads padded rows (4e, 4e+1, 4e+2);
    # odd  output row 2o+1 reads padded rows (4o+2, 4o+3, 4o+4).
    lhs_e = xr[:, 0:4 * q].reshape(B, q, 4, K1)[:, :, 0:3].reshape(B * q, 3 * K1)
    lhs_o = xr[:, 2:2 + 4 * q].reshape(B, q, 4, K1)[:, :, 0:3].reshape(B * q, 3 * K1)

    # Batch tiling: fill the MXU M dimension (M = BT*q rows per grid step,
    # 256 rows on a full tile; v5e simply runs it as two 128-row passes) while
    # keeping M a multiple of 8 sublanes.
    unit = max(1, 8 // q)                            # images per 8-sublane group
    BT = min(max(unit, 256 // q), -(-B // unit) * unit)
    Bp = -(-B // BT) * BT
    if Bp != B:
        pad = (Bp - B) * q
        lhs_e = jnp.pad(lhs_e, ((0, pad), (0, 0)))
        lhs_o = jnp.pad(lhs_o, ((0, pad), (0, 0)))
    M = BT * q

    # Host-precomputed constant row mask (no per-step iota/compare in-kernel):
    # zero the ky=0 contribution on the first output row of every image.
    mask = np.ones((M, 1), np.float32)
    mask[::q] = 0.0

    out = pl.pallas_call(
        _fused_patch_embed_kernel,
        out_shape=jax.ShapeDtypeStruct((Bp * q, N2), jnp.float32),
        grid=(Bp // BT,),
        in_specs=[
            pl.BlockSpec((M, 3 * K1), lambda i: (i, 0)),      # lhs even
            pl.BlockSpec((M, 3 * K1), lambda i: (i, 0)),      # lhs odd
            pl.BlockSpec((3 * K1, N1), lambda i: (0, 0)),     # W1cat (constant)
            pl.BlockSpec((1, N1), lambda i: (0, 0)),          # s1
            pl.BlockSpec((1, N1), lambda i: (0, 0)),          # t1
            pl.BlockSpec((N1, N2), lambda i: (0, 0)),         # W2 ky=1
            pl.BlockSpec((N1, N2), lambda i: (0, 0)),         # W2 ky=2
            pl.BlockSpec((N1, N2), lambda i: (0, 0)),         # W2 ky=0
            pl.BlockSpec((1, N2), lambda i: (0, 0)),          # s2
            pl.BlockSpec((1, N2), lambda i: (0, 0)),          # t2
            pl.BlockSpec((M, 1), lambda i: (0, 0)),           # roll mask (constant)
        ],
        out_specs=pl.BlockSpec((M, N2), lambda i: (i, 0)),
        compiler_params=pltpu.CompilerParams(
            dimension_semantics=("parallel",),
            vmem_limit_bytes=32 * 1024 * 1024),
    )(lhs_e, lhs_o, W1cat, prep["s1f"], prep["t1f"],
      prep["W2a"], prep["W2b"], prep["W2c"], prep["s2f"], prep["t2f"],
      jnp.asarray(mask))

    # (Bp*q, Wo2*E) rows (b, oy2) -> (B, Ho2*Wo2, E); free reshape in XLA.
    E = N2 // (W // 4)
    return out[:B * q].reshape(B, q * (W // 4), E)


# ---------------- one-time host-side parameter preparation ----------------

def prepare_params(params, img_size=16):
    """Fold BN / post_affine and build the structured (stride-2 + padding folded,
    ky-tap-merged) conv weight matrices once at init time."""
    w1 = np.asarray(params["conv"][0]["w"])     # (3,3,Cin,C1)  HWIO
    w2 = np.asarray(params["conv"][1]["w"])     # (3,3,C1,C2)
    C0, C1 = w1.shape[2], w1.shape[3]
    C2 = w2.shape[3]
    H = W = img_size
    Wo1, Wo2 = W // 2, W // 4
    K1 = C0 * W                                 # 48  (row layout ci*W + wx)
    N1 = Wo1 * C1                               # 128 (lane-full, no W-pad blocks)
    N2 = Wo2 * C2                               # 128

    # conv1: tap-merged input row-group (3 padded rows contiguously) -> output row
    W1cat = np.zeros((3 * K1, N1), np.float32)
    for ky in range(3):
        for ox1 in range(Wo1):
            for kx in range(3):
                wx = 2 * ox1 + kx - 1
                if 0 <= wx < W:
                    for ci in range(C0):
                        W1cat[ky * K1 + ci * W + wx,
                              ox1 * C1:(ox1 + 1) * C1] = w1[ky, kx, ci]

    # conv2: one structured matrix per ky tap; W-pad edge taps simply dropped.
    def _w2_tap(ky):
        m = np.zeros((N1, N2), np.float32)
        for ox2 in range(Wo2):
            for kx in range(3):
                ox1 = 2 * ox2 + kx - 1
                if 0 <= ox1 < Wo1:
                    m[ox1 * C1:(ox1 + 1) * C1,
                      ox2 * C2:(ox2 + 1) * C2] = w2[ky, kx]
        return m
    W2a, W2b, W2c = _w2_tap(1), _w2_tap(2), _w2_tap(0)

    # fold BN (inference / running stats) and post_affine into scale/shift
    l1, l2 = params["conv"][0], params["conv"][1]
    inv1 = np.asarray(l1["bn_gamma"]) / np.sqrt(np.asarray(l1["bn_var"]) + l1["bn_eps"])
    s1 = inv1
    t1 = np.asarray(l1["bn_beta"]) - np.asarray(l1["bn_mean"]) * inv1
    inv2 = np.asarray(l2["bn_gamma"]) / np.sqrt(np.asarray(l2["bn_var"]) + l2["bn_eps"])
    pa = np.asarray(params["post_alpha"])
    pb = np.asarray(params["post_beta"])
    s2 = inv2 * pa
    t2 = (np.asarray(l2["bn_beta"]) - np.asarray(l2["bn_mean"]) * inv2) * pa + pb

    return dict(
        W1cat=jnp.asarray(W1cat),
        W2a=jnp.asarray(W2a), W2b=jnp.asarray(W2b), W2c=jnp.asarray(W2c),
        s1f=jnp.asarray(np.tile(s1, Wo1)[None, :].astype(np.float32)),
        t1f=jnp.asarray(np.tile(t1, Wo1)[None, :].astype(np.float32)),
        s2f=jnp.asarray(np.tile(s2, Wo2)[None, :].astype(np.float32)),
        t2f=jnp.asarray(np.tile(t2, Wo2)[None, :].astype(np.float32)),
        pre_alpha=params["pre_alpha"], pre_beta=params["pre_beta"],
    )


# ---------------- reference (pure JAX, for correctness check) ----------------

def ref_forward(x_nchw, params):
    x = (x_nchw * params["pre_alpha"].reshape(1, -1, 1, 1)
         + params["pre_beta"].reshape(1, -1, 1, 1))
    n = len(params["conv"])
    for li, layer in enumerate(params["conv"]):
        x = lax.conv_general_dilated(
            x, layer["w"], window_strides=(2, 2), padding=((1, 1), (1, 1)),
            dimension_numbers=("NCHW", "HWIO", "NCHW"))
        inv = layer["bn_gamma"] / jnp.sqrt(layer["bn_var"] + layer["bn_eps"])
        x = (x * inv.reshape(1, -1, 1, 1)
             + (layer["bn_beta"] - layer["bn_mean"] * inv).reshape(1, -1, 1, 1))
        if li != n - 1:
            x = 0.5 * x * (1.0 + lax.erf(x / jnp.sqrt(jnp.float32(2.0))))
    x = (x * params["post_alpha"].reshape(1, -1, 1, 1)
         + params["post_beta"].reshape(1, -1, 1, 1))
    B, Cc, Hp, Wp = x.shape
    return jnp.transpose(x.reshape(B, Cc, Hp * Wp), (0, 2, 1))


# ---------------- deterministic parameter init ----------------

def init_params(key, in_chans=3, embed_dim=32):
    # patch_size=4 branch: conv3x3(3, E//2, 2)+BN, GELU, conv3x3(E//2, E, 2)+BN
    dims = [in_chans, embed_dim // 2, embed_dim]
    ks = list(jax.random.split(key, 5 * (len(dims) - 1) + 4))
    conv = []
    for cin, cout in zip(dims[:-1], dims[1:]):
        w = jax.random.normal(ks.pop(), (3, 3, cin, cout), jnp.float32) / np.sqrt(9 * cin)
        conv.append(dict(
            w=w,
            bn_gamma=1.0 + 0.1 * jax.random.normal(ks.pop(), (cout,), jnp.float32),
            bn_beta=0.1 * jax.random.normal(ks.pop(), (cout,), jnp.float32),
            bn_mean=0.1 * jax.random.normal(ks.pop(), (cout,), jnp.float32),
            bn_var=jnp.abs(jax.random.normal(ks.pop(), (cout,), jnp.float32)) + 0.5,
            bn_eps=1e-5,
        ))
    return dict(
        conv=conv,
        pre_alpha=1.0 + 0.1 * jax.random.normal(ks.pop(), (in_chans,), jnp.float32),
        pre_beta=0.1 * jax.random.normal(ks.pop(), (in_chans,), jnp.float32),
        post_alpha=1.0 + 0.1 * jax.random.normal(ks.pop(), (embed_dim,), jnp.float32),
        post_beta=0.1 * jax.random.normal(ks.pop(), (embed_dim,), jnp.float32),
    )


if __name__ == "__main__":
    key = jax.random.PRNGKey(0)
    k_x, k_p, k_x2 = jax.random.split(key, 3)
    params = init_params(k_p, in_chans=3, embed_dim=32)
    prep = prepare_params(params, img_size=16)

    fwd = jax.jit(conv_patch_embed_forward)

    # small-shape check matching the module config: (2, 3, 16, 16) -> (2, 16, 32)
    x = jax.random.normal(k_x, (2, 3, 16, 16), jnp.float32)
    out = jax.block_until_ready(fwd(x, prep))
    ref = jax.block_until_ready(ref_forward(x, params))
    assert out.shape == (2, 16, 32), out.shape
    np.testing.assert_allclose(np.asarray(out), np.asarray(ref), rtol=5e-4, atol=5e-4)

    # batched-path check: multi grid step, batch-tile padding, cross-image roll mask
    xb = jax.random.normal(k_x2, (96, 3, 16, 16), jnp.float32)
    outb = jax.block_until_ready(fwd(xb, prep))
    refb = jax.block_until_ready(ref_forward(xb, params))
    assert outb.shape == (96, 16, 32), outb.shape
    np.testing.assert_allclose(np.asarray(outb), np.asarray(refb), rtol=1e-3, atol=1e-3)

    print("KERNEL_OK")
</pallas_src>

<mosaic_0001>
module attributes {stable_mosaic.version = 11 : i64} {
  func.func @_fused_patch_embed_kernel(%arg0: i32, %arg1: memref<8x144xf32, #tpu.memory_space<vmem>>, %arg2: memref<8x144xf32, #tpu.memory_space<vmem>>, %arg3: memref<144x128xf32, #tpu.memory_space<vmem>>, %arg4: memref<1x128xf32, #tpu.memory_space<vmem>>, %arg5: memref<1x128xf32, #tpu.memory_space<vmem>>, %arg6: memref<128x128xf32, #tpu.memory_space<vmem>>, %arg7: memref<128x128xf32, #tpu.memory_space<vmem>>, %arg8: memref<128x128xf32, #tpu.memory_space<vmem>>, %arg9: memref<1x128xf32, #tpu.memory_space<vmem>>, %arg10: memref<1x128xf32, #tpu.memory_space<vmem>>, %arg11: memref<8x1xf32, #tpu.memory_space<vmem>>, %arg12: memref<8x128xf32, #tpu.memory_space<vmem>>) attributes {dimension_semantics = [#tpu.dimension_semantics<parallel>], iteration_bounds = array<i64: 1>, scalar_prefetch = 0 : i64, scratch_operands = 0 : i64, tpu.core_type = #tpu.core_type<tc>, window_params = [{transform_indices = @transform_0, window_bounds = array<i64: 8, 144>}, {transform_indices = @transform_1, window_bounds = array<i64: 8, 144>}, {pipeline_mode = #tpu.pipeline_mode<synchronous>, transform_indices = @transform_2, window_bounds = array<i64: 144, 128>}, {pipeline_mode = #tpu.pipeline_mode<synchronous>, transform_indices = @transform_3, window_bounds = array<i64: 1, 128>}, {pipeline_mode = #tpu.pipeline_mode<synchronous>, transform_indices = @transform_4, window_bounds = array<i64: 1, 128>}, {pipeline_mode = #tpu.pipeline_mode<synchronous>, transform_indices = @transform_5, window_bounds = array<i64: 128, 128>}, {pipeline_mode = #tpu.pipeline_mode<synchronous>, transform_indices = @transform_6, window_bounds = array<i64: 128, 128>}, {pipeline_mode = #tpu.pipeline_mode<synchronous>, transform_indices = @transform_7, window_bounds = array<i64: 128, 128>}, {pipeline_mode = #tpu.pipeline_mode<synchronous>, transform_indices = @transform_8, window_bounds = array<i64: 1, 128>}, {pipeline_mode = #tpu.pipeline_mode<synchronous>, transform_indices = @transform_9, window_bounds = array<i64: 1, 128>}, {pipeline_mode = #tpu.pipeline_mode<synchronous>, transform_indices = @transform_10, window_bounds = array<i64: 8, 1>}, {transform_indices = @transform_11, window_bounds = array<i64: 8, 128>}]} {
    %c0 = arith.constant 0 : index
    %c0_0 = arith.constant 0 : index
    %0 = vector.load %arg3[%c0, %c0_0] : memref<144x128xf32, #tpu.memory_space<vmem>>, vector<144x128xf32>
    %c0_1 = arith.constant 0 : index
    %c0_2 = arith.constant 0 : index
    %1 = vector.load %arg1[%c0_1, %c0_2] : memref<8x144xf32, #tpu.memory_space<vmem>>, vector<8x144xf32>
    %cst = arith.constant dense<0.000000e+00> : vector<8x128xf32>
    %2 = tpu.matmul %1, %0, %cst {dimension_numbers = #tpu.dot_dimension_numbers<[1], [0], [0], [1], [0, 0, 1, 1], [], []>} : vector<8x144xf32>, vector<144x128xf32>, vector<8x128xf32> -> vector<8x128xf32>
    %c0_3 = arith.constant 0 : index
    %c0_4 = arith.constant 0 : index
    %3 = vector.load %arg2[%c0_3, %c0_4] : memref<8x144xf32, #tpu.memory_space<vmem>>, vector<8x144xf32>
    %cst_5 = arith.constant dense<0.000000e+00> : vector<8x128xf32>
    %4 = tpu.matmul %3, %0, %cst_5 {dimension_numbers = #tpu.dot_dimension_numbers<[1], [0], [0], [1], [0, 0, 1, 1], [], []>} : vector<8x144xf32>, vector<144x128xf32>, vector<8x128xf32> -> vector<8x128xf32>
    %c0_6 = arith.constant 0 : index
    %c0_7 = arith.constant 0 : index
    %5 = vector.load %arg4[%c0_6, %c0_7] : memref<1x128xf32, #tpu.memory_space<vmem>>, vector<1x128xf32>
    %c0_8 = arith.constant 0 : index
    %c0_9 = arith.constant 0 : index
    %6 = vector.load %arg5[%c0_8, %c0_9] : memref<1x128xf32, #tpu.memory_space<vmem>>, vector<1x128xf32>
    %7 = vector.broadcast %5 : vector<1x128xf32> to vector<8x128xf32>
    %8 = arith.mulf %2, %7 : vector<8x128xf32>
    %9 = vector.broadcast %6 : vector<1x128xf32> to vector<8x128xf32>
    %10 = arith.addf %8, %9 : vector<8x128xf32>
    %11 = vector.broadcast %5 : vector<1x128xf32> to vector<8x128xf32>
    %12 = arith.mulf %4, %11 : vector<8x128xf32>
    %13 = vector.broadcast %6 : vector<1x128xf32> to vector<8x128xf32>
    %14 = arith.addf %12, %13 : vector<8x128xf32>
    %cst_10 = arith.constant 5.000000e-01 : f32
    %15 = vector.broadcast %cst_10 : f32 to vector<8x128xf32>
    %16 = arith.mulf %15, %10 : vector<8x128xf32>
    %cst_11 = arith.constant 0.707106769 : f32
    %17 = vector.broadcast %cst_11 : f32 to vector<8x128xf32>
    %18 = arith.mulf %10, %17 : vector<8x128xf32>
    %19 = math.erf %18 : vector<8x128xf32>
    %cst_12 = arith.constant 1.000000e+00 : f32
    %20 = vector.broadcast %cst_12 : f32 to vector<8x128xf32>
    %21 = arith.addf %20, %19 : vector<8x128xf32>
    %22 = arith.mulf %16, %21 : vector<8x128xf32>
    %cst_13 = arith.constant 5.000000e-01 : f32
    %23 = vector.broadcast %cst_13 : f32 to vector<8x128xf32>
    %24 = arith.mulf %23, %14 : vector<8x128xf32>
    %cst_14 = arith.constant 0.707106769 : f32
    %25 = vector.broadcast %cst_14 : f32 to vector<8x128xf32>
    %26 = arith.mulf %14, %25 : vector<8x128xf32>
    %27 = math.erf %26 : vector<8x128xf32>
    %cst_15 = arith.constant 1.000000e+00 : f32
    %28 = vector.broadcast %cst_15 : f32 to vector<8x128xf32>
    %29 = arith.addf %28, %27 : vector<8x128xf32>
    %30 = arith.mulf %24, %29 : vector<8x128xf32>
    %c0_16 = arith.constant 0 : index
    %c0_17 = arith.constant 0 : index
    %31 = vector.load %arg6[%c0_16, %c0_17] : memref<128x128xf32, #tpu.memory_space<vmem>>, vector<128x128xf32>
    %cst_18 = arith.constant dense<0.000000e+00> : vector<8x128xf32>
    %32 = tpu.matmul %22, %31, %cst_18 {dimension_numbers = #tpu.dot_dimension_numbers<[1], [0], [0], [1], [0, 0, 1, 1], [], []>} : vector<8x128xf32>, vector<128x128xf32>, vector<8x128xf32> -> vector<8x128xf32>
    %c0_19 = arith.constant 0 : index
    %c0_20 = arith.constant 0 : index
    %33 = vector.load %arg7[%c0_19, %c0_20] : memref<128x128xf32, #tpu.memory_space<vmem>>, vector<128x128xf32>
    %cst_21 = arith.constant dense<0.000000e+00> : vector<8x128xf32>
    %34 = tpu.matmul %30, %33, %cst_21 {dimension_numbers = #tpu.dot_dimension_numbers<[1], [0], [0], [1], [0, 0, 1, 1], [], []>} : vector<8x128xf32>, vector<128x128xf32>, vector<8x128xf32> -> vector<8x128xf32>
    %35 = arith.addf %32, %34 : vector<8x128xf32>
    %c0_22 = arith.constant 0 : index
    %c0_23 = arith.constant 0 : index
    %36 = vector.load %arg8[%c0_22, %c0_23] : memref<128x128xf32, #tpu.memory_space<vmem>>, vector<128x128xf32>
    %cst_24 = arith.constant dense<0.000000e+00> : vector<8x128xf32>
    %37 = tpu.matmul %30, %36, %cst_24 {dimension_numbers = #tpu.dot_dimension_numbers<[1], [0], [0], [1], [0, 0, 1, 1], [], []>} : vector<8x128xf32>, vector<128x128xf32>, vector<8x128xf32> -> vector<8x128xf32>
    %c1_i32 = arith.constant 1 : i32
    %38 = tpu.dynamic_rotate %37 by %c1_i32 dim 0 : vector<8x128xf32>, i32 -> vector<8x128xf32>
    %c0_25 = arith.constant 0 : index
    %c0_26 = arith.constant 0 : index
    %39 = vector.load %arg11[%c0_25, %c0_26] : memref<8x1xf32, #tpu.memory_space<vmem>>, vector<8x1xf32>
    %40 = vector.broadcast %39 : vector<8x1xf32> to vector<8x128xf32>
    %41 = arith.mulf %38, %40 : vector<8x128xf32>
    %42 = arith.addf %35, %41 : vector<8x128xf32>
    %c0_27 = arith.constant 0 : index
    %c0_28 = arith.constant 0 : index
    %43 = vector.load %arg9[%c0_27, %c0_28] : memref<1x128xf32, #tpu.memory_space<vmem>>, vector<1x128xf32>
    %44 = vector.broadcast %43 : vector<1x128xf32> to vector<8x128xf32>
    %45 = arith.mulf %42, %44 : vector<8x128xf32>
    %c0_29 = arith.constant 0 : index
    %c0_30 = arith.constant 0 : index
    %46 = vector.load %arg10[%c0_29, %c0_30] : memref<1x128xf32, #tpu.memory_space<vmem>>, vector<1x128xf32>
    %47 = vector.broadcast %46 : vector<1x128xf32> to vector<8x128xf32>
    %48 = arith.addf %45, %47 : vector<8x128xf32>
    %c0_31 = arith.constant 0 : index
    %c0_32 = arith.constant 0 : index
    %49 = vector.load %arg12[%c0_31, %c0_32] : memref<8x128xf32, #tpu.memory_space<vmem>>, vector<8x128xf32>
    tpu.vector_store %arg12[%c0_31, %c0_32], %48 {strides = array<i32>} : memref<8x128xf32, #tpu.memory_space<vmem>>, vector<8x128xf32>,
    return
  }
  func.func @transform_0(%arg0: i32) -> (i32, i32) {
    %c0_i32 = arith.constant 0 : i32
    %c0_i32_0 = arith.constant 0 : i32
    return %arg0, %c0_i32 : i32, i32
  }
  func.func @transform_1(%arg0: i32) -> (i32, i32) {
    %c0_i32 = arith.constant 0 : i32
    %c0_i32_0 = arith.constant 0 : i32
    return %arg0, %c0_i32 : i32, i32
  }
  func.func @transform_2(%arg0: i32) -> (i32, i32) {
    %c0_i32 = arith.constant 0 : i32
    %c0_i32_0 = arith.constant 0 : i32
    %c0_i32_1 = arith.constant 0 : i32
    return %c0_i32, %c0_i32_0 : i32, i32
  }
  func.func @transform_3(%arg0: i32) -> (i32, i32) {
    %c0_i32 = arith.constant 0 : i32
    %c0_i32_0 = arith.constant 0 : i32
    %c0_i32_1 = arith.constant 0 : i32
    return %c0_i32, %c0_i32_0 : i32, i32
  }
  func.func @transform_4(%arg0: i32) -> (i32, i32) {
    %c0_i32 = arith.constant 0 : i32
    %c0_i32_0 = arith.constant 0 : i32
    %c0_i32_1 = arith.constant 0 : i32
    return %c0_i32, %c0_i32_0 : i32, i32
  }
  func.func @transform_5(%arg0: i32) -> (i32, i32) {
    %c0_i32 = arith.constant 0 : i32
    %c0_i32_0 = arith.constant 0 : i32
    %c0_i32_1 = arith.constant 0 : i32
    return %c0_i32, %c0_i32_0 : i32, i32
  }
  func.func @transform_6(%arg0: i32) -> (i32, i32) {
    %c0_i32 = arith.constant 0 : i32
    %c0_i32_0 = arith.constant 0 : i32
    %c0_i32_1 = arith.constant 0 : i32
    return %c0_i32, %c0_i32_0 : i32, i32
  }
  func.func @transform_7(%arg0: i32) -> (i32, i32) {
    %c0_i32 = arith.constant 0 : i32
    %c0_i32_0 = arith.constant 0 : i32
    %c0_i32_1 = arith.constant 0 : i32
    return %c0_i32, %c0_i32_0 : i32, i32
  }
  func.func @transform_8(%arg0: i32) -> (i32, i32) {
    %c0_i32 = arith.constant 0 : i32
    %c0_i32_0 = arith.constant 0 : i32
    %c0_i32_1 = arith.constant 0 : i32
    return %c0_i32, %c0_i32_0 : i32, i32
  }
  func.func @transform_9(%arg0: i32) -> (i32, i32) {
    %c0_i32 = arith.constant 0 : i32
    %c0_i32_0 = arith.constant 0 : i32
    %c0_i32_1 = arith.constant 0 : i32
    return %c0_i32, %c0_i32_0 : i32, i32
  }
  func.func @transform_10(%arg0: i32) -> (i32, i32) {
    %c0_i32 = arith.constant 0 : i32
    %c0_i32_0 = arith.constant 0 : i32
    %c0_i32_1 = arith.constant 0 : i32
    return %c0_i32, %c0_i32_0 : i32, i32
  }
  func.func @transform_11(%arg0: i32) -> (i32, i32) {
    %c0_i32 = arith.constant 0 : i32
    %c0_i32_0 = arith.constant 0 : i32
    return %arg0, %c0_i32 : i32, i32
  }
}

</mosaic_0001>

<bundles_post_ra>
// kernel: conv_patch_embed_forward.1
= control target key start
LH: loop header
LB: loop body
LE: loop exit
PB: predicated region body
PF: predicated region fallthrough
CT: control target
= control target key end

     0   :  { %v820_v0 = vmov 0.0|0.0   ;;  %vm58_vm0 = vcmask 130048   ;;  %vm821_vm1 = vmmov 0   ;;  %s1157_s2 = inlined_call_operand.vmem [shape: f32[144,128], index: 2, kind: input, shape index: {}]   ;;  %s1158_s0 = inlined_call_operand.vmem [shape: f32[8,144], index: 0, kind: input, shape index: {}]   ;;  %s1159_s1 = inlined_call_operand.vmem [shape: f32[8,144], index: 1, kind: input, shape index: {}]   ;;  %s1160_s6 = inlined_call_operand.vmem [shape: f32[128,128], index: 6, kind: input, shape index: {}]   ;;  %s1161_s5 = inlined_call_operand.vmem [shape: f32[128,128], index: 5, kind: input, shape index: {}]   ;;  %s1162_s10 = inlined_call_operand.vmem [shape: f32[8,1], index: 10, kind: input, shape index: {}]   ;;  %s1163_s3 = inlined_call_operand.vmem [shape: f32[1,128], index: 3, kind: input, shape index: {}]   ;;  %s1164_s4 = inlined_call_operand.vmem [shape: f32[1,128], index: 4, kind: input, shape index: {}]   ;;  %s1165_s7 = inlined_call_operand.vmem [shape: f32[128,128], index: 7, kind: input, shape index: {}]   ;;  %s1166_s8 = inlined_call_operand.vmem [shape: f32[1,128], index: 8, kind: input, shape index: {}]   ;;  %s1167_s9 = inlined_call_operand.vmem [shape: f32[1,128], index: 9, kind: input, shape index: {}]   ;;  %s1168_s11 = inlined_call_operand.vmem [shape: f32[8,128], index: 11, kind: output, shape index: {}]  }
   0x1   :  { %685 = vmatprep.subr.bf16.mxu0 %v820_v0  ;;  %712 = vmatprep.subr.bf16.mxu1 %v820_v0  ;;  %v38_v1 = vld [vmem:[%s1157_s2] sm:$0xff]  ;;  %v39_v2 = vld [vmem:[%s1157_s2 + $0x8] sm:$0xff]  ;;  %v40_v3 = vld [vmem:[%s1157_s2 + $0x10] sm:$0xff] }
   0x2   :  { %v686_v4 = vpack.c.bf16 %v39_v2, %v38_v1  ;;  %v41_v5 = vld [vmem:[%s1157_s2 + $0x18] sm:$0xff]  ;;  %v42_v7 = vld [vmem:[%s1157_s2 + $0x20] sm:$0xff]  ;;  %v43_v8 = vld [vmem:[%s1157_s2 + $0x28] sm:$0xff] }
   0x3   :  { %v689_v6 = vpack.c.bf16 %v41_v5, %v40_v3  ;;  %v57_v9 = vld [vmem:[%s1158_s0 + $0x8] sm:$0xff]  ;;  %v692_v11 = vpack.c.bf16 %v43_v8, %v42_v7  ;;  %v44_v12 = vld [vmem:[%s1157_s2 + $0x30] sm:$0xff]  ;;  %v45_v13 = vld [vmem:[%s1157_s2 + $0x38] sm:$0xff] }
   0x4   :  { %687 = vmatpush1.bf16.msra.mxu0 %v686_v4  ;;  %714 = vmatpush1.bf16.msra.mxu1 %v686_v4  ;;  %v133_v10 = vld [vmem:[%s1159_s1 + $0x8] sm:$0xff]  ;;  %v695_v14 = vpack.c.bf16 %v45_v13, %v44_v12  ;;  %v46_v15 = vld [vmem:[%s1157_s2 + $0x40] sm:$0xff]  ;;  %v48_v18 = vld [vmem:[%s1157_s2 + $0x50] sm:$0xff] }
   0x5   :  { %688 = vmatprep.subr.bf16.mxu0 %v820_v0  ;;  %715 = vmatprep.subr.bf16.mxu1 %v820_v0  ;;  %v47_v16 = vld [vmem:[%s1157_s2 + $0x48] sm:$0xff]  ;;  %v49_v19 = vld [vmem:[%s1157_s2 + $0x58] sm:$0xff]  ;;  %v50_v21 = vld [vmem:[%s1157_s2 + $0x60] sm:$0xff] }
   0x6   :  { %523 = vmatprep.mubr.msk.f32.mxu0 %vm58_vm0, %v57_v9  ;;  %524 = vmatprep.mubr.msk.f32.mxu1 %vm58_vm0, %v133_v10  ;;  %v698_v17 = vpack.c.bf16 %v47_v16, %v46_v15  ;;  %v701_v20 = vpack.c.bf16 %v49_v19, %v48_v18  ;;  %v51_v22 = vld [vmem:[%s1157_s2 + $0x68] sm:$0xff]  ;;  %v52_v24 = vld [vmem:[%s1157_s2 + $0x70] sm:$0xff]  ;;  %v53_v25 = vld [vmem:[%s1157_s2 + $0x78] sm:$0xff]  ;;  %v823_v18 = vmov 0  }
   0x7   :  { %v704_v23 = vpack.c.bf16 %v51_v22, %v50_v21  ;;  %v707_v26 = vpack.c.bf16 %v53_v25, %v52_v24  ;;  %v54_v27 = vld [vmem:[%s1157_s2 + $0x80] sm:$0xff]  ;;  %v55_v28 = vld [vmem:[%s1157_s2 + $0x88] sm:$0xff]  ;;  %v253_v38 = vld [vmem:[%s1160_s6 + $0x10] sm:$0xff]  ;;  %815 = vset.pattern.permute.xlu0 %v823_v18 }
   0x8   :  { %690 = vmatpush1.bf16.msra.mxu0 %v689_v6  ;;  %717 = vmatpush1.bf16.msra.mxu1 %v689_v6  ;;  %v710_v29 = vpack.c.bf16 %v55_v28, %v54_v27  ;;  %v251_v30 = vld [vmem:[%s1160_s6] sm:$0xff]  ;;  %v252_v31 = vld [vmem:[%s1160_s6 + $0x8] sm:$0xff]  ;;  %v254_v39 = vld [vmem:[%s1160_s6 + $0x18] sm:$0xff] }
   0x9   :  { %691 = vmatprep.subr.bf16.mxu0 %v820_v0  ;;  %718 = vmatprep.subr.bf16.mxu1 %v820_v0  ;;  %v235_v32 = vld [vmem:[%s1161_s5] sm:$0xff]  ;;  %v236_v33 = vld [vmem:[%s1161_s5 + $0x8] sm:$0xff]  ;;  %v740_v36 = vpack.c.bf16 %v252_v31, %v251_v30  ;;  %v237_v40 = vld [vmem:[%s1161_s5 + $0x10] sm:$0xff]  ;;  %v743_v42 = vpack.c.bf16 %v254_v39, %v253_v38 }
   0xa   :  { %v56_v34 = vld [vmem:[%s1158_s0] sm:$0xff]  ;;  %v764_v37 = vpack.c.bf16 %v236_v33, %v235_v32  ;;  %v238_v41 = vld [vmem:[%s1161_s5 + $0x18] sm:$0xff]  ;;  %v256_v45 = vld [vmem:[%s1160_s6 + $0x28] sm:$0xff] }
   0xb   :  { %v132_v35 = vld [vmem:[%s1159_s1] sm:$0xff]  ;;  %v767_v43 = vpack.c.bf16 %v238_v41, %v237_v40  ;;  %v240_v47 = vld [vmem:[%s1161_s5 + $0x28] sm:$0xff]  ;;  %v257_v50 = vld [vmem:[%s1160_s6 + $0x30] sm:$0xff] }
   0xc   :  { %693 = vmatpush1.bf16.msra.mxu0 %v692_v11  ;;  %720 = vmatpush1.bf16.msra.mxu1 %v692_v11  ;;  %v255_v44 = vld [vmem:[%s1160_s6 + $0x20] sm:$0xff]  ;;  %v258_v51 = vld [vmem:[%s1160_s6 + $0x38] sm:$0xff]  ;;  %v241_v52 = vld [vmem:[%s1161_s5 + $0x30] sm:$0xff] }
   0xd   :  { %694 = vmatprep.subr.bf16.mxu0 %v820_v0  ;;  %721 = vmatprep.subr.bf16.mxu1 %v820_v0  ;;  %v239_v46 = vld [vmem:[%s1161_s5 + $0x20] sm:$0xff]  ;;  %v746_v48 = vpack.c.bf16 %v256_v45, %v255_v44  ;;  %v242_v53 = vld [vmem:[%s1161_s5 + $0x38] sm:$0xff]  ;;  %v749_v54 = vpack.c.bf16 %v258_v51, %v257_v50  ;;  %v260_v57 = vld [vmem:[%s1160_s6 + $0x48] sm:$0xff] }
   0xe   :  { %v770_v49 = vpack.c.bf16 %v240_v47, %v239_v46  ;;  %v773_v55 = vpack.c.bf16 %v242_v53, %v241_v52  ;;  %v259_v56 = vld [vmem:[%s1160_s6 + $0x40] sm:$0xff]  ;;  %v244_v60 = vld [vmem:[%s1161_s5 + $0x48] sm:$0xff]  ;;  %v261_v62 = vld [vmem:[%s1160_s6 + $0x50] sm:$0xff] }
   0xf   :  { %v752_v58 = vpack.c.bf16 %v260_v57, %v259_v56  ;;  %v243_v59 = vld [vmem:[%s1161_s5 + $0x40] sm:$0xff]  ;;  %v262_v63 = vld [vmem:[%s1160_s6 + $0x58] sm:$0xff]  ;;  %v245_v2 = vld [vmem:[%s1161_s5 + $0x50] sm:$0xff] }
  0x10   :  { %696 = vmatpush1.bf16.msra.mxu0 %v695_v14  ;;  %723 = vmatpush1.bf16.msra.mxu1 %v695_v14  ;;  %v776_v61 = vpack.c.bf16 %v244_v60, %v243_v59  ;;  %v755_v1 = vpack.c.bf16 %v262_v63, %v261_v62  ;;  %v246_v3 = vld [vmem:[%s1161_s5 + $0x58] sm:$0xff]  ;;  %v263_v5 = vld [vmem:[%s1160_s6 + $0x60] sm:$0xff]  ;;  %v264_v6 = vld [vmem:[%s1160_s6 + $0x68] sm:$0xff] }
  0x11   :  { %697 = vmatprep.subr.bf16.mxu0 %v820_v0  ;;  %724 = vmatprep.subr.bf16.mxu1 %v820_v0  ;;  %v779_v4 = vpack.c.bf16 %v246_v3, %v245_v2  ;;  %v758_v7 = vpack.c.bf16 %v264_v6, %v263_v5  ;;  %v247_v8 = vld [vmem:[%s1161_s5 + $0x60] sm:$0xff]  ;;  %v248_v9 = vld [vmem:[%s1161_s5 + $0x68] sm:$0xff]  ;;  %v265_v11 = vld [vmem:[%s1160_s6 + $0x70] sm:$0xff] }
  0x12   :  { %v782_v10 = vpack.c.bf16 %v248_v9, %v247_v8  ;;  %v266_v12 = vld [vmem:[%s1160_s6 + $0x78] sm:$0xff]  ;;  %v249_v14 = vld [vmem:[%s1161_s5 + $0x70] sm:$0xff]  ;;  %v494_v19 = vld [vmem:[%s1162_s10] sm:$0xff] }
  0x13   :  { %v761_v13 = vpack.c.bf16 %v266_v12, %v265_v11  ;;  %v250_v15 = vld [vmem:[%s1161_s5 + $0x78] sm:$0xff]  ;;  %497 = vperm.xlu0 %815, %v494_v19   ;;  %v526_v22 = vld [vmem:[%s1164_s4] ss:$0 sm:$0xff]  ;;  %v412_v47 = vld [vmem:[%s1165_s7 + $0x28] sm:$0xff] }
  0x14   :  { %699 = vmatpush1.bf16.msra.mxu0 %v698_v17  ;;  %726 = vmatpush1.bf16.msra.mxu1 %v698_v17  ;;  %v785_v16 = vpack.c.bf16 %v250_v15, %v249_v14  ;;  %v822_v17 = vmov 0.0   ;;  %v410_v44 = vld [vmem:[%s1165_s7 + $0x18] sm:$0xff]  ;;  %v411_v46 = vld [vmem:[%s1165_s7 + $0x20] sm:$0xff]  ;;  %v416_v53 = vld [vmem:[%s1165_s7 + $0x48] sm:$0xff] }
  0x15   :  { %700 = vmatprep.subr.bf16.mxu0 %v820_v0  ;;  %727 = vmatprep.subr.bf16.mxu1 %v820_v0  ;;  %v414_v50 = vld [vmem:[%s1165_s7 + $0x38] sm:$0xff]  ;;  %v415_v52 = vld [vmem:[%s1165_s7 + $0x40] sm:$0xff]  ;;  %v420_v59 = vld [vmem:[%s1165_s7 + $0x68] sm:$0xff] }
  0x16   :  { %v418_v56 = vld [vmem:[%s1165_s7 + $0x58] sm:$0xff]  ;;  %v527_v11 = vld [vmem:[%s1166_s8] ss:$0 sm:$0xff] }
  0x17   :  { %v422_v62 = vld [vmem:[%s1165_s7 + $0x78] sm:$0xff] }
  0x18   :  { %702 = vmatpush1.bf16.msra.mxu0 %v701_v20  ;;  %729 = vmatpush1.bf16.msra.mxu1 %v701_v20  ;;  %v525_v20 = vld [vmem:[%s1163_s3] ss:$0 sm:$0xff] }
  0x19   :  { %703 = vmatprep.subr.bf16.mxu0 %v820_v0  ;;  %730 = vmatprep.subr.bf16.mxu1 %v820_v0 }
  0x1c   :  { %705 = vmatpush1.bf16.msra.mxu0 %v704_v23  ;;  %732 = vmatpush1.bf16.msra.mxu1 %v704_v23 }
  0x1d   :  { %706 = vmatprep.subr.bf16.mxu0 %v820_v0  ;;  %733 = vmatprep.subr.bf16.mxu1 %v820_v0 }
  0x20   :  { %708 = vmatpush1.bf16.msra.mxu0 %v707_v26  ;;  %735 = vmatpush1.bf16.msra.mxu1 %v707_v26 }
  0x21   :  { %709 = vmatprep.subr.bf16.mxu0 %v820_v0  ;;  %736 = vmatprep.subr.bf16.mxu1 %v820_v0 }
  0x24   :  { %711 = vmatpush1.bf16.msra.mxu0 %v710_v29  ;;  %738 = vmatpush1.bf16.msra.mxu1 %v710_v29 }
  0x25   :  { %739 = vmatprep.subr.bf16.mxu0 %v820_v0  ;;  %763 = vmatprep.subr.bf16.mxu1 %v820_v0 }
  0x27   :  { %127 = vmatmul.mubr.f32.vlgmr.msra.gmra.mrb[0].mxu0 %v56_v34  ;;  %202 = vmatmul.mubr.f32.vlgmr.msra.gmra.mrb[0].mxu1 %v132_v35  ;;  %v407_v34 = vld [vmem:[%s1165_s7] sm:$0xff]  ;;  %v408_v35 = vld [vmem:[%s1165_s7 + $0x8] sm:$0xff] }
  0x28   :  { %741 = vmatpush3.bf16.msra.mxu0 %v740_v36  ;;  %765 = vmatpush3.bf16.msra.mxu1 %v764_v37  ;;  %v788_v41 = vpack.c.bf16 %v408_v35, %v407_v34 }
  0x29   :  { %742 = vmatprep.subr.bf16.mxu0 %v820_v0  ;;  %766 = vmatprep.subr.bf16.mxu1 %v820_v0 }
  0x2a   :  { %612 = vmatprep.mubr.msk.f32.mxu0 %vm821_vm1, %v822_v17  ;;  %647 = vmatprep.mubr.msk.f32.mxu1 %vm821_vm1, %v822_v17 }
  0x2c   :  { %744 = vmatpush3.bf16.msra.mxu0 %v743_v42  ;;  %768 = vmatpush3.bf16.msra.mxu1 %v767_v43  ;;  %v409_v43 = vld [vmem:[%s1165_s7 + $0x10] sm:$0xff] }
  0x2d   :  { %745 = vmatprep.subr.bf16.mxu0 %v820_v0  ;;  %769 = vmatprep.subr.bf16.mxu1 %v820_v0  ;;  %v791_v45 = vpack.c.bf16 %v410_v44, %v409_v43 }
  0x30   :  { %747 = vmatpush3.bf16.msra.mxu0 %v746_v48  ;;  %771 = vmatpush3.bf16.msra.mxu1 %v770_v49  ;;  %v794_v48 = vpack.c.bf16 %v412_v47, %v411_v46  ;;  %v413_v49 = vld [vmem:[%s1165_s7 + $0x30] sm:$0xff] }
  0x31   :  { %748 = vmatprep.subr.bf16.mxu0 %v820_v0  ;;  %772 = vmatprep.subr.bf16.mxu1 %v820_v0  ;;  %v797_v51 = vpack.c.bf16 %v414_v50, %v413_v49 }
  0x34   :  { %750 = vmatpush3.bf16.msra.mxu0 %v749_v54  ;;  %774 = vmatpush3.bf16.msra.mxu1 %v773_v55  ;;  %v800_v54 = vpack.c.bf16 %v416_v53, %v415_v52  ;;  %v417_v55 = vld [vmem:[%s1165_s7 + $0x50] sm:$0xff] }
  0x35   :  { %751 = vmatprep.subr.bf16.mxu0 %v820_v0  ;;  %775 = vmatprep.subr.bf16.mxu1 %v820_v0  ;;  %v803_v57 = vpack.c.bf16 %v418_v56, %v417_v55 }
  0x38   :  { %753 = vmatpush3.bf16.msra.mxu0 %v752_v58  ;;  %777 = vmatpush3.bf16.msra.mxu1 %v776_v61  ;;  %v419_v58 = vld [vmem:[%s1165_s7 + $0x60] sm:$0xff]  ;;  %v421_v61 = vld [vmem:[%s1165_s7 + $0x70] sm:$0xff] }
  0x39   :  { %754 = vmatprep.subr.bf16.mxu0 %v820_v0  ;;  %778 = vmatprep.subr.bf16.mxu1 %v820_v0  ;;  %v806_v60 = vpack.c.bf16 %v420_v59, %v419_v58  ;;  %v809_v63 = vpack.c.bf16 %v422_v62, %v421_v61 }
  0x3c   :  { %756 = vmatpush3.bf16.msra.mxu0 %v755_v1  ;;  %780 = vmatpush3.bf16.msra.mxu1 %v779_v4 }
  0x3d   :  { %757 = vmatprep.subr.bf16.mxu0 %v820_v0  ;;  %781 = vmatprep.subr.bf16.mxu1 %v820_v0 }
  0x40   :  { %759 = vmatpush3.bf16.msra.mxu0 %v758_v7  ;;  %783 = vmatpush3.bf16.msra.mxu1 %v782_v10 }
  0x41   :  { %760 = vmatprep.subr.bf16.mxu0 %v820_v0  ;;  %784 = vmatprep.subr.bf16.mxu1 %v820_v0 }
  0x44   :  { %762 = vmatpush3.bf16.msra.mxu0 %v761_v13  ;;  %786 = vmatpush3.bf16.msra.mxu1 %v785_v16 }
  0x45   :  { %787 = vmatprep.subr.bf16.mxu0 %v820_v0 }
  0x92   :  { %v498_v7 = vpop.permute.xlu0 %497 }
  0xfa   :  { %v128_v21 = vpop.f32.mrb[0].mxu0  ;;  %v203_v23 = vpop.f32.mrb[0].mxu1 }
  0xfb   :  { %v215_v24 = vmul.f32 %v525_v20, %v128_v21  ;;  %v223_v25 = vmul.f32 %v525_v20, %v203_v23  ;;  %v205_v26 = vpop.f32.mrb[1].mxu1  ;;  %v130_v27 = vpop.f32.mrb[1].mxu0 }
  0xfd   :  { %v222_v28 = vadd.f32 %v526_v22, %v215_v24  ;;  %v224_v29 = vadd.f32 %v526_v22, %v223_v25 }
  0xff   :  { %v226_v30 = vmul.f32 0.70710677, %v222_v28  ;;  %v231_v31 = vmul.f32 0.70710677, %v224_v29  ;;  %v225_v32 = vmul.f32 0.5, %v222_v28  ;;  %v230_v38 = vmul.f32 0.5, %v224_v29 }
 0x101   :  { %816 = verf.f32 %v226_v30 }
 0x102   :  { %818 = verf.f32 %v231_v31 }
 0x10b   :  { %v817_v33 = vpop.eup %816 }
 0x10c   :  { %v819_v36 = vpop.eup %818  ;;  %v228_v37 = vadd.f32 1.0, %v817_v33 }
 0x10d   :  { %v233_v39 = vadd.f32 1.0, %v819_v36 }
 0x10e   :  { %v229_v40 = vmul.f32 %v228_v37, %v225_v32 }
 0x10f   :  { %v234_v42 = vmul.f32 %v233_v39, %v230_v38 }
 0x110   :  { %648 = vmatmul.mubr.f32.vlgmr.msra.gmra.mrb[2].mxu1 %v229_v40 }
 0x111   :  { %613 = vmatmul.mubr.f32.vlgmr.msra.gmra.mrb[2].mxu0 %v234_v42 }
 0x112   :  { %789 = vmatpush3.bf16.msra.mxu0 %v788_v41  ;;  %682 = vmatprep.mubr.msk.f32.mxu0 %vm821_vm1, %v822_v17 }
 0x113   :  { %790 = vmatprep.subr.bf16.mxu0 %v820_v0 }
 0x116   :  { %792 = vmatpush3.bf16.msra.mxu0 %v791_v45 }
 0x117   :  { %793 = vmatprep.subr.bf16.mxu0 %v820_v0 }
 0x11a   :  { %795 = vmatpush3.bf16.msra.mxu0 %v794_v48 }
 0x11b   :  { %796 = vmatprep.subr.bf16.mxu0 %v820_v0 }
 0x11e   :  { %798 = vmatpush3.bf16.msra.mxu0 %v797_v51 }
 0x11f   :  { %799 = vmatprep.subr.bf16.mxu0 %v820_v0 }
 0x122   :  { %801 = vmatpush3.bf16.msra.mxu0 %v800_v54 }
 0x123   :  { %802 = vmatprep.subr.bf16.mxu0 %v820_v0 }
 0x126   :  { %804 = vmatpush3.bf16.msra.mxu0 %v803_v57 }
 0x127   :  { %805 = vmatprep.subr.bf16.mxu0 %v820_v0 }
 0x12a   :  { %807 = vmatpush3.bf16.msra.mxu0 %v806_v60 }
 0x12b   :  { %808 = vmatprep.subr.bf16.mxu0 %v820_v0  ;;  %v528_v0 = vld [vmem:[%s1167_s9] ss:$0 sm:$0xff] }
 0x12e   :  { %810 = vmatpush3.bf16.msra.mxu0 %v809_v63 }
 0x131   :  { %683 = vmatmul.mubr.f32.vlgmr.msra.gmra.mrb[4].mxu0 %v234_v42 }
 0x1e3   :  { %v403_v1 = vpop.f32.mrb[2].mxu1 }
 0x1e4   :  { %v333_v2 = vpop.f32.mrb[2].mxu0  ;;  %v649_v3 = vpop.f32.mrb[3].mxu1 }
 0x1e5   :  { %v404_v4 = vadd.f32 %v403_v1, %v333_v2  ;;  %v614_v5 = vpop.f32.mrb[3].mxu0 }
 0x204   :  { %v489_v6 = vpop.f32.mrb[4].mxu0 }
 0x205   :  { %v493_v8 = vrot.slane %v489_v6, 7  ;;  %v684_v9 = vpop.f32.mrb[5].mxu0 }
 0x207   :  { %v500_v10 = vmul.f32 %v498_v7, %v493_v8 }
 0x209   :  { %v501_v12 = vadd.f32 %v500_v10, %v404_v4 }
 0x20b   :  { %v509_v13 = vmul.f32 %v527_v11, %v501_v12 }
 0x20d   :  { %v517_v14 = vadd.f32 %v528_v0, %v509_v13 }
 0x20f   :  { %518 = vst [vmem:[%s1168_s11] sm:$0xff] %v517_v14 }

</bundles_post_ra>
